<compile_context>
chip_gen: v7x
topology: tpu7x:2x2x1
jax: 0.10.0
libtpu: 0.0.40
codegen_flags: <defaults>
</compile_context>

<pallas_src>
import functools

import jax
import jax.numpy as jnp
from jax import lax
from jax.experimental import pallas as pl
from jax.experimental.pallas import tpu as pltpu


# --------------------------------------------------------------------------------------
# Pass 1: banded convolution (+ bias/ReLU when no norm, else raw conv + per-image stats)
# --------------------------------------------------------------------------------------
def _conv_pass_kernel(x_ref, w_ref, b_ref, *out_refs, KH, KW, stride, use_norm, use_act):
    # x_ref : (1, s*s*bir, Wd, Cin)   stride-phase-decomposed, halo'd input band
    # w_ref : (KH*KW, Cin, Coutp)     per-tap weights, Cout padded to 128 lanes
    # b_ref : (1, Coutp)              conv bias (only used when use_norm=False)
    # out_refs:
    #   use_norm: y_ref (1, br, Wout, Coutp) f32, sum_ref (1,1,Coutp), sumsq_ref (1,1,Coutp)
    #   else    : y_ref (1, br, Wout, Coutp) out_dtype
    if use_norm:
        y_ref, sum_ref, sumsq_ref = out_refs
    else:
        (y_ref,) = out_refs

    _, br, Wout, Coutp = y_ref.shape
    Cin = x_ref.shape[3]
    rows = br * Wout
    bir = x_ref.shape[1] // (stride * stride)   # input rows per stride-phase in this band
    t = pl.program_id(1)

    if use_norm:
        @pl.when(t == 0)
        def _init():
            sum_ref[...] = jnp.zeros_like(sum_ref)
            sumsq_ref[...] = jnp.zeros_like(sumsq_ref)

    # Tap accumulation: KH*KW small (rows, Cin) @ (Cin, Coutp) MXU matmuls, f32 accumulate.
    # (No im2col scratch; every tap is a dense static slice of the phase-decomposed band.)
    acc = jnp.zeros((rows, Coutp), jnp.float32)
    for kh in range(KH):
        for kw in range(KW):
            p = (kh % stride) * stride + (kw % stride)      # stride-phase index
            r0 = p * bir + kh // stride                      # static row offset
            q0 = kw // stride                                # static col offset
            tap = x_ref[0, pl.ds(r0, br), pl.ds(q0, Wout), :]        # (br, Wout, Cin)
            acc = acc + jnp.dot(tap.reshape(rows, Cin), w_ref[kh * KW + kw],
                                preferred_element_type=jnp.float32)

    if use_norm:
        # Conv bias is skipped: it cancels exactly under the mean subtraction.
        sum_ref[...] += jnp.sum(acc, axis=0, keepdims=True).reshape(1, 1, Coutp)
        sumsq_ref[...] += jnp.sum(acc * acc, axis=0, keepdims=True).reshape(1, 1, Coutp)
    else:
        acc = acc + b_ref[...].astype(jnp.float32)
        if use_act:
            acc = jnp.maximum(acc, 0.0)

    y_ref[0, :, :, :] = acc.reshape(br, Wout, Coutp).astype(y_ref.dtype)


# --------------------------------------------------------------------------------------
# Pass 2: per-image InstanceNorm affine + optional ReLU, applied band by band
# --------------------------------------------------------------------------------------
def _norm_pass_kernel(y_ref, scale_ref, shift_ref, o_ref, *, use_act):
    # y_ref     : (1, br, Wout, Coutp) f32 pre-norm conv band
    # scale_ref : (1, 1, Coutp) f32     gamma / sqrt(var + eps)   (per image)
    # shift_ref : (1, 1, Coutp) f32     beta - mean * scale       (per image)
    y = y_ref[0, :, :, :].astype(jnp.float32)               # (br, Wout, Coutp)
    scale = scale_ref[...].reshape(1, 1, -1)
    shift = shift_ref[...].reshape(1, 1, -1)
    out = y * scale + shift
    if use_act:
        out = jnp.maximum(out, 0.0)
    o_ref[0, :, :, :] = out.astype(o_ref.dtype)


# --------------------------------------------------------------------------------------
# Wrapper
# --------------------------------------------------------------------------------------
def _vmem_limit_bytes():
    try:
        cap = int(pltpu.get_tpu_info().vmem_capacity_bytes)
    except Exception:                      # conservative fallback (safe on v7x too)
        cap = 64 * 1024 * 1024
    # ~48 MiB on v7x (64 MiB physical), ~96 MiB on v5e/v6e (128 MiB physical).
    return max(32 * 1024 * 1024, int(cap * 0.75))


def _pick_band_rows(band_rows, Hout, Wout, Wd, Cin, Coutp, s, kh_off, cdt_bytes,
                    vmem_limit):
    if band_rows is None:
        # Target >= ~1024 MXU rows per band (tile-sweep sweet spot), bounded below.
        band_rows = max(1, min(Hout, -(-1024 // Wout)))
    br = max(1, min(int(band_rows), Hout))

    budget = int(vmem_limit * 0.4)   # leave room for weights, pipeline slack, spills

    def band_bytes(b):
        bir = b + kh_off
        in_b = 2 * s * s * bir * Wd * Cin * cdt_bytes      # double-buffered input band
        out_b = 2 * b * Wout * Coutp * 4                   # double-buffered output band
        acc_b = b * Wout * Coutp * 4                       # f32 accumulator
        return in_b + out_b + acc_b

    while br > 1 and (Hout % br != 0 or band_bytes(br) > budget):
        br -= 1
    return br


def conv_block(x_nchw, w_oihw, bias, gamma, beta, *, stride=1, padding=1,
               use_activation=True, use_instance_norm=True, eps=1e-5,
               band_rows=None, compute_dtype=jnp.bfloat16):
    """Pallas ConvBlock forward.  x_nchw: (N, Cin, H, W) -> (N, Cout, Hout, Wout).

    compute_dtype=jnp.bfloat16 (default) uses the bf16 MXU path with f32 accumulation;
    pass compute_dtype=jnp.float32 for bit-level validation against the reference.
    """
    N, Cin, H, W = x_nchw.shape
    Cout, Cin_w, KH, KW = w_oihw.shape
    assert Cin_w == Cin
    s = int(stride)
    out_dtype = x_nchw.dtype
    cdt = jnp.dtype(out_dtype) if compute_dtype is None else jnp.dtype(compute_dtype)
    cdt_bytes = cdt.itemsize
    vmem_limit = _vmem_limit_bytes()

    # ---- glue: NCHW -> NHWC + reflect padding (padding_mode='reflect') ----
    x = jnp.transpose(x_nchw, (0, 2, 3, 1))
    x = jnp.pad(x, ((0, 0), (padding, padding), (padding, padding), (0, 0)),
                mode="reflect")
    Hp, Wp = H + 2 * padding, W + 2 * padding
    Hout = (Hp - KH) // s + 1
    Wout = (Wp - KW) // s + 1

    # ---- glue: stride-phase deinterleave so every in-kernel load is dense ----
    Hd, Wd = -(-Hp // s), -(-Wp // s)
    phases = []
    for ph in range(s):
        for pw in range(s):
            xp = x[:, ph::s, pw::s, :]
            xp = jnp.pad(xp, ((0, 0), (0, Hd - xp.shape[1]),
                              (0, Wd - xp.shape[2]), (0, 0)))
            phases.append(xp)
    x_ph = jnp.stack(phases, axis=1)            # (N, s*s, Hd, Wd, Cin)

    kh_off = (KH - 1) // s
    kw_off = (KW - 1) // s
    # Every row/col a tap actually reads is in-bounds of the phase-decomposed image.
    assert Hout - 1 + kh_off <= Hd - 1 and Wout - 1 + kw_off <= Wd - 1

    # ---- lane padding: Cout -> multiple of 128 (lane-dense stores, full MXU N-dim) ----
    Coutp = -(-Cout // 128) * 128

    br = _pick_band_rows(band_rows, Hout, Wout, Wd, Cin, Coutp, s, kh_off,
                         cdt_bytes, vmem_limit)
    nb = Hout // br
    bir = br + kh_off

    # ---- glue: H-band gather with KH-halo (banded, pipelined input DMA) ----
    row_idx = jnp.arange(nb)[:, None] * br + jnp.arange(bir)[None, :]
    row_idx = jnp.minimum(row_idx, Hd - 1)      # only touches never-read halo tail rows
    xb = x_ph[:, :, row_idx]                    # (N, s*s, nb, bir, Wd, Cin)
    xb = jnp.moveaxis(xb, 2, 1).reshape(N * nb, s * s * bir, Wd, Cin).astype(cdt)

    # ---- weights / per-channel params, Cout padded to Coutp lanes ----
    w3 = jnp.transpose(w_oihw, (2, 3, 1, 0)).reshape(KH * KW, Cin, Cout)
    w3 = jnp.pad(w3, ((0, 0), (0, 0), (0, Coutp - Cout))).astype(cdt)
    b2 = jnp.pad(bias, (0, Coutp - Cout)).reshape(1, Coutp).astype(jnp.float32)
    gamma_p = jnp.pad(gamma, (0, Coutp - Cout)).astype(jnp.float32)
    beta_p = jnp.pad(beta, (0, Coutp - Cout)).astype(jnp.float32)

    conv_kernel = functools.partial(_conv_pass_kernel, KH=KH, KW=KW, stride=s,
                                    use_norm=use_instance_norm, use_act=use_activation)

    y_band_spec = pl.BlockSpec((1, br, Wout, Coutp), lambda n, t: (n, t, 0, 0))
    if use_instance_norm:
        out_shape1 = (jax.ShapeDtypeStruct((N, Hout, Wout, Coutp), jnp.float32),
                      jax.ShapeDtypeStruct((N, 1, Coutp), jnp.float32),
                      jax.ShapeDtypeStruct((N, 1, Coutp), jnp.float32))
        out_specs1 = (y_band_spec,
                      pl.BlockSpec((1, 1, Coutp), lambda n, t: (n, 0, 0)),
                      pl.BlockSpec((1, 1, Coutp), lambda n, t: (n, 0, 0)))
        sem1 = ("parallel", "arbitrary")     # stats accumulate across the band axis
        y1_bytes = N * Hout * Wout * Coutp * 4
    else:
        out_shape1 = jax.ShapeDtypeStruct((N, Hout, Wout, Coutp), out_dtype)
        out_specs1 = y_band_spec
        sem1 = ("parallel", "parallel")
        y1_bytes = N * Hout * Wout * Coutp * jnp.dtype(out_dtype).itemsize

    flops1 = 2 * N * Hout * Wout * Coutp * KH * KW * Cin
    bytes1 = int(xb.size) * cdt_bytes + int(w3.size) * cdt_bytes + y1_bytes

    res = pl.pallas_call(
        conv_kernel,
        out_shape=out_shape1,
        grid_spec=pltpu.PrefetchScalarGridSpec(
            num_scalar_prefetch=0,
            grid=(N, nb),
            in_specs=[
                pl.BlockSpec((1, s * s * bir, Wd, Cin),
                             lambda n, t: (n * nb + t, 0, 0, 0)),
                pl.BlockSpec((KH * KW, Cin, Coutp), lambda n, t: (0, 0, 0)),
                pl.BlockSpec((1, Coutp), lambda n, t: (0, 0)),
            ],
            out_specs=out_specs1,
        ),
        compiler_params=pltpu.CompilerParams(
            dimension_semantics=sem1,
            vmem_limit_bytes=vmem_limit),
        cost_estimate=pl.CostEstimate(flops=flops1, transcendentals=0,
                                      bytes_accessed=bytes1),
    )(xb, w3, b2)

    if use_instance_norm:
        y1, sum1, sumsq1 = res
        # Per-image stats -> affine scale/shift (tiny, plain-JAX between the two kernels).
        cnt = float(Hout * Wout)
        mean = sum1[:, 0, :] / cnt                                     # (N, Coutp)
        var = jnp.maximum(sumsq1[:, 0, :] / cnt - mean * mean, 0.0)
        inv_std = lax.rsqrt(var + eps)
        scale = (gamma_p[None, :] * inv_std)[:, None, :]               # (N, 1, Coutp)
        shift = (beta_p[None, :] - mean * gamma_p[None, :] * inv_std)[:, None, :]

        norm_kernel = functools.partial(_norm_pass_kernel, use_act=use_activation)
        flops2 = 2 * N * Hout * Wout * Coutp
        bytes2 = N * Hout * Wout * Coutp * (4 + jnp.dtype(out_dtype).itemsize)
        y_out = pl.pallas_call(
            norm_kernel,
            out_shape=jax.ShapeDtypeStruct((N, Hout, Wout, Coutp), out_dtype),
            grid_spec=pltpu.PrefetchScalarGridSpec(
                num_scalar_prefetch=0,
                grid=(N, nb),
                in_specs=[
                    pl.BlockSpec((1, br, Wout, Coutp), lambda n, t: (n, t, 0, 0)),
                    pl.BlockSpec((1, 1, Coutp), lambda n, t: (n, 0, 0)),
                    pl.BlockSpec((1, 1, Coutp), lambda n, t: (n, 0, 0)),
                ],
                out_specs=pl.BlockSpec((1, br, Wout, Coutp), lambda n, t: (n, t, 0, 0)),
            ),
            compiler_params=pltpu.CompilerParams(
                dimension_semantics=("parallel", "parallel"),
                vmem_limit_bytes=vmem_limit),
            cost_estimate=pl.CostEstimate(flops=flops2, transcendentals=0,
                                          bytes_accessed=bytes2),
        )(y1, scale, shift)
    else:
        y_out = res

    if Coutp != Cout:
        y_out = y_out[..., :Cout]
    return jnp.transpose(y_out, (0, 3, 1, 2))                         # back to NCHW


# --------------------------------------------------------------------------------------
# Pure-JAX reference (mirrors the PyTorch module)
# --------------------------------------------------------------------------------------
def _reference(x_nchw, w_oihw, bias, gamma, beta, *, stride, padding,
               use_activation, use_instance_norm, eps=1e-5):
    x_pad = jnp.pad(x_nchw, ((0, 0), (0, 0), (padding, padding), (padding, padding)),
                    mode="reflect")
    y = lax.conv_general_dilated(
        x_pad, w_oihw, window_strides=(stride, stride), padding="VALID",
        dimension_numbers=("NCHW", "OIHW", "NCHW"))
    y = y + bias[None, :, None, None]
    if use_instance_norm:
        mean = jnp.mean(y, axis=(2, 3), keepdims=True)
        var = jnp.mean((y - mean) ** 2, axis=(2, 3), keepdims=True)
        y = (y - mean) * lax.rsqrt(var + eps)
        y = y * gamma[None, :, None, None] + beta[None, :, None, None]
    if use_activation:
        y = jnp.maximum(y, 0.0)
    return y


if __name__ == "__main__":
    # ConvBlock(4, 8, kernel_size=3, stride, padding=1)
    N, Cin, H, W = 2, 4, 16, 16
    Cout, K = 8, 3

    key = jax.random.PRNGKey(0)
    kx, kw_, kb = jax.random.split(key, 3)
    x = jax.random.normal(kx, (N, Cin, H, W), dtype=jnp.float32)
    w = jax.random.normal(kw_, (Cout, Cin, K, K), dtype=jnp.float32) * 0.1
    b = jax.random.normal(kb, (Cout,), dtype=jnp.float32) * 0.1
    gamma = jnp.ones((Cout,), dtype=jnp.float32)   # InstanceNorm2d affine weight init
    beta = jnp.zeros((Cout,), dtype=jnp.float32)   # InstanceNorm2d affine bias init

    # 1) stride=1, multi-band (exercises cross-band stats accumulation), f32 validation
    out = conv_block(x, w, b, gamma, beta, stride=1, padding=1,
                     use_activation=True, use_instance_norm=True,
                     band_rows=8, compute_dtype=jnp.float32)
    out = jax.block_until_ready(out)
    ref = _reference(x, w, b, gamma, beta, stride=1, padding=1,
                     use_activation=True, use_instance_norm=True)
    assert out.shape == (N, Cout, H, W)
    assert jnp.allclose(out, ref, atol=2e-4, rtol=2e-4), "stride=1 mismatch vs reference"

    # 2) stride=2 downsampling (exercises the stride-phase deinterleave), f32 validation
    out2 = conv_block(x, w, b, gamma, beta, stride=2, padding=1,
                      use_activation=True, use_instance_norm=True,
                      band_rows=4, compute_dtype=jnp.float32)
    out2 = jax.block_until_ready(out2)
    ref2 = _reference(x, w, b, gamma, beta, stride=2, padding=1,
                      use_activation=True, use_instance_norm=True)
    assert out2.shape == (N, Cout, 8, 8)
    assert jnp.allclose(out2, ref2, atol=2e-4, rtol=2e-4), "stride=2 mismatch vs reference"

    # 3) no-InstanceNorm path (conv + bias + ReLU only), auto band rows, f32 validation
    out3 = conv_block(x, w, b, gamma, beta, stride=1, padding=1,
                      use_activation=True, use_instance_norm=False,
                      compute_dtype=jnp.float32)
    out3 = jax.block_until_ready(out3)
    ref3 = _reference(x, w, b, gamma, beta, stride=1, padding=1,
                      use_activation=True, use_instance_norm=False)
    assert jnp.allclose(out3, ref3, atol=2e-4, rtol=2e-4), "no-norm mismatch vs reference"

    # 4) default production config: bf16 MXU compute, auto band rows (loose tolerance)
    out4 = conv_block(x, w, b, gamma, beta, stride=1, padding=1,
                      use_activation=True, use_instance_norm=True)
    out4 = jax.block_until_ready(out4)
    assert out4.shape == (N, Cout, H, W)
    assert jnp.allclose(out4, ref, atol=5e-2, rtol=5e-2), "bf16 mismatch vs reference"

    print("KERNEL_OK")
</pallas_src>

<mosaic_0001>
module attributes {stable_mosaic.version = 11 : i64} {
  func.func @_conv_pass_kernel(%arg0: i32, %arg1: i32, %arg2: memref<1x10x18x4xf32, #tpu.memory_space<vmem>>, %arg3: memref<9x4x128xf32, #tpu.memory_space<vmem>>, %arg4: memref<1x128xf32, #tpu.memory_space<vmem>>, %arg5: memref<1x8x16x128xf32, #tpu.memory_space<vmem>>, %arg6: memref<1x1x128xf32, #tpu.memory_space<vmem>>, %arg7: memref<1x1x128xf32, #tpu.memory_space<vmem>>) attributes {dimension_semantics = [#tpu.dimension_semantics<parallel>, #tpu.dimension_semantics<arbitrary>], iteration_bounds = array<i64: 2, 2>, scalar_prefetch = 0 : i64, scratch_operands = 0 : i64, tpu.core_type = #tpu.core_type<tc>, window_params = [{transform_indices = @transform_0, window_bounds = array<i64: 1, 10, 18, 4>}, {pipeline_mode = #tpu.pipeline_mode<synchronous>, transform_indices = @transform_1, window_bounds = array<i64: 9, 4, 128>}, {pipeline_mode = #tpu.pipeline_mode<synchronous>, transform_indices = @transform_2, window_bounds = array<i64: 1, 128>}, {transform_indices = @transform_3, window_bounds = array<i64: 1, 8, 16, 128>}, {transform_indices = @transform_4, window_bounds = array<i64: 1, 1, 128>}, {transform_indices = @transform_5, window_bounds = array<i64: 1, 1, 128>}]} {
    %c0_i32 = arith.constant 0 : i32
    %0 = arith.cmpi eq, %arg1, %c0_i32 : i32
    %1 = arith.extui %0 : i1 to i32
    %c0_i32_0 = arith.constant 0 : i32
    %2 = arith.cmpi ne, %1, %c0_i32_0 : i32
    scf.if %2 {
      %cst_82 = arith.constant 0.000000e+00 : f32
      %84 = vector.broadcast %cst_82 : f32 to vector<1x1x128xf32>
      %c0_83 = arith.constant 0 : index
      %c0_84 = arith.constant 0 : index
      %c0_85 = arith.constant 0 : index
      %85 = vector.load %arg6[%c0_83, %c0_84, %c0_85] : memref<1x1x128xf32, #tpu.memory_space<vmem>>, vector<1x1x128xf32>
      tpu.vector_store %arg6[%c0_83, %c0_84, %c0_85], %84 {strides = array<i32>} : memref<1x1x128xf32, #tpu.memory_space<vmem>>, vector<1x1x128xf32>,
      %cst_86 = arith.constant 0.000000e+00 : f32
      %86 = vector.broadcast %cst_86 : f32 to vector<1x1x128xf32>
      %c0_87 = arith.constant 0 : index
      %c0_88 = arith.constant 0 : index
      %c0_89 = arith.constant 0 : index
      %87 = vector.load %arg7[%c0_87, %c0_88, %c0_89] : memref<1x1x128xf32, #tpu.memory_space<vmem>>, vector<1x1x128xf32>
      tpu.vector_store %arg7[%c0_87, %c0_88, %c0_89], %86 {strides = array<i32>} : memref<1x1x128xf32, #tpu.memory_space<vmem>>, vector<1x1x128xf32>,
    } else {
    }
    %cst = arith.constant 0.000000e+00 : f32
    %3 = vector.broadcast %cst : f32 to vector<128x128xf32>
    %c0 = arith.constant 0 : index
    %c0_1 = arith.constant 0 : index
    %c0_2 = arith.constant 0 : index
    %c0_3 = arith.constant 0 : index
    %4 = vector.load %arg2[%c0, %c0_1, %c0_2, %c0_3] : memref<1x10x18x4xf32, #tpu.memory_space<vmem>>, vector<1x8x16x4xf32>
    %5 = vector.shape_cast %4 : vector<1x8x16x4xf32> to vector<8x16x4xf32>
    %6 = vector.shape_cast %5 : vector<8x16x4xf32> to vector<128x4xf32>
    %c0_4 = arith.constant 0 : index
    %c0_5 = arith.constant 0 : index
    %c0_6 = arith.constant 0 : index
    %7 = vector.load %arg3[%c0_4, %c0_5, %c0_6] : memref<9x4x128xf32, #tpu.memory_space<vmem>>, vector<1x4x128xf32>
    %8 = vector.shape_cast %7 : vector<1x4x128xf32> to vector<4x128xf32>
    %cst_7 = arith.constant dense<0.000000e+00> : vector<128x128xf32>
    %9 = tpu.matmul %6, %8, %cst_7 {dimension_numbers = #tpu.dot_dimension_numbers<[1], [0], [0], [1], [0, 0, 1, 1], [], []>} : vector<128x4xf32>, vector<4x128xf32>, vector<128x128xf32> -> vector<128x128xf32>
    %10 = arith.addf %3, %9 : vector<128x128xf32>
    %c0_8 = arith.constant 0 : index
    %c0_9 = arith.constant 0 : index
    %c1 = arith.constant 1 : index
    %c0_10 = arith.constant 0 : index
    %11 = vector.load %arg2[%c0_8, %c0_9, %c1, %c0_10] : memref<1x10x18x4xf32, #tpu.memory_space<vmem>>, vector<1x8x16x4xf32>
    %12 = vector.shape_cast %11 : vector<1x8x16x4xf32> to vector<8x16x4xf32>
    %13 = vector.shape_cast %12 : vector<8x16x4xf32> to vector<128x4xf32>
    %c1_11 = arith.constant 1 : index
    %c0_12 = arith.constant 0 : index
    %c0_13 = arith.constant 0 : index
    %14 = vector.load %arg3[%c1_11, %c0_12, %c0_13] : memref<9x4x128xf32, #tpu.memory_space<vmem>>, vector<1x4x128xf32>
    %15 = vector.shape_cast %14 : vector<1x4x128xf32> to vector<4x128xf32>
    %cst_14 = arith.constant dense<0.000000e+00> : vector<128x128xf32>
    %16 = tpu.matmul %13, %15, %cst_14 {dimension_numbers = #tpu.dot_dimension_numbers<[1], [0], [0], [1], [0, 0, 1, 1], [], []>} : vector<128x4xf32>, vector<4x128xf32>, vector<128x128xf32> -> vector<128x128xf32>
    %17 = arith.addf %10, %16 : vector<128x128xf32>
    %c0_15 = arith.constant 0 : index
    %c0_16 = arith.constant 0 : index
    %c2 = arith.constant 2 : index
    %c0_17 = arith.constant 0 : index
    %18 = vector.load %arg2[%c0_15, %c0_16, %c2, %c0_17] : memref<1x10x18x4xf32, #tpu.memory_space<vmem>>, vector<1x8x16x4xf32>
    %19 = vector.shape_cast %18 : vector<1x8x16x4xf32> to vector<8x16x4xf32>
    %20 = vector.shape_cast %19 : vector<8x16x4xf32> to vector<128x4xf32>
    %c2_18 = arith.constant 2 : index
    %c0_19 = arith.constant 0 : index
    %c0_20 = arith.constant 0 : index
    %21 = vector.load %arg3[%c2_18, %c0_19, %c0_20] : memref<9x4x128xf32, #tpu.memory_space<vmem>>, vector<1x4x128xf32>
    %22 = vector.shape_cast %21 : vector<1x4x128xf32> to vector<4x128xf32>
    %cst_21 = arith.constant dense<0.000000e+00> : vector<128x128xf32>
    %23 = tpu.matmul %20, %22, %cst_21 {dimension_numbers = #tpu.dot_dimension_numbers<[1], [0], [0], [1], [0, 0, 1, 1], [], []>} : vector<128x4xf32>, vector<4x128xf32>, vector<128x128xf32> -> vector<128x128xf32>
    %24 = arith.addf %17, %23 : vector<128x128xf32>
    %c0_22 = arith.constant 0 : index
    %c1_23 = arith.constant 1 : index
    %c0_24 = arith.constant 0 : index
    %c0_25 = arith.constant 0 : index
    %25 = vector.load %arg2[%c0_22, %c1_23, %c0_24, %c0_25] : memref<1x10x18x4xf32, #tpu.memory_space<vmem>>, vector<1x8x16x4xf32>
    %26 = vector.shape_cast %25 : vector<1x8x16x4xf32> to vector<8x16x4xf32>
    %27 = vector.shape_cast %26 : vector<8x16x4xf32> to vector<128x4xf32>
    %c3 = arith.constant 3 : index
    %c0_26 = arith.constant 0 : index
    %c0_27 = arith.constant 0 : index
    %28 = vector.load %arg3[%c3, %c0_26, %c0_27] : memref<9x4x128xf32, #tpu.memory_space<vmem>>, vector<1x4x128xf32>
    %29 = vector.shape_cast %28 : vector<1x4x128xf32> to vector<4x128xf32>
    %cst_28 = arith.constant dense<0.000000e+00> : vector<128x128xf32>
    %30 = tpu.matmul %27, %29, %cst_28 {dimension_numbers = #tpu.dot_dimension_numbers<[1], [0], [0], [1], [0, 0, 1, 1], [], []>} : vector<128x4xf32>, vector<4x128xf32>, vector<128x128xf32> -> vector<128x128xf32>
    %31 = arith.addf %24, %30 : vector<128x128xf32>
    %c0_29 = arith.constant 0 : index
    %c1_30 = arith.constant 1 : index
    %c1_31 = arith.constant 1 : index
    %c0_32 = arith.constant 0 : index
    %32 = vector.load %arg2[%c0_29, %c1_30, %c1_31, %c0_32] : memref<1x10x18x4xf32, #tpu.memory_space<vmem>>, vector<1x8x16x4xf32>
    %33 = vector.shape_cast %32 : vector<1x8x16x4xf32> to vector<8x16x4xf32>
    %34 = vector.shape_cast %33 : vector<8x16x4xf32> to vector<128x4xf32>
    %c4 = arith.constant 4 : index
    %c0_33 = arith.constant 0 : index
    %c0_34 = arith.constant 0 : index
    %35 = vector.load %arg3[%c4, %c0_33, %c0_34] : memref<9x4x128xf32, #tpu.memory_space<vmem>>, vector<1x4x128xf32>
    %36 = vector.shape_cast %35 : vector<1x4x128xf32> to vector<4x128xf32>
    %cst_35 = arith.constant dense<0.000000e+00> : vector<128x128xf32>
    %37 = tpu.matmul %34, %36, %cst_35 {dimension_numbers = #tpu.dot_dimension_numbers<[1], [0], [0], [1], [0, 0, 1, 1], [], []>} : vector<128x4xf32>, vector<4x128xf32>, vector<128x128xf32> -> vector<128x128xf32>
    %38 = arith.addf %31, %37 : vector<128x128xf32>
    %c0_36 = arith.constant 0 : index
    %c1_37 = arith.constant 1 : index
    %c2_38 = arith.constant 2 : index
    %c0_39 = arith.constant 0 : index
    %39 = vector.load %arg2[%c0_36, %c1_37, %c2_38, %c0_39] : memref<1x10x18x4xf32, #tpu.memory_space<vmem>>, vector<1x8x16x4xf32>
    %40 = vector.shape_cast %39 : vector<1x8x16x4xf32> to vector<8x16x4xf32>
    %41 = vector.shape_cast %40 : vector<8x16x4xf32> to vector<128x4xf32>
    %c5 = arith.constant 5 : index
    %c0_40 = arith.constant 0 : index
    %c0_41 = arith.constant 0 : index
    %42 = vector.load %arg3[%c5, %c0_40, %c0_41] : memref<9x4x128xf32, #tpu.memory_space<vmem>>, vector<1x4x128xf32>
    %43 = vector.shape_cast %42 : vector<1x4x128xf32> to vector<4x128xf32>
    %cst_42 = arith.constant dense<0.000000e+00> : vector<128x128xf32>
    %44 = tpu.matmul %41, %43, %cst_42 {dimension_numbers = #tpu.dot_dimension_numbers<[1], [0], [0], [1], [0, 0, 1, 1], [], []>} : vector<128x4xf32>, vector<4x128xf32>, vector<128x128xf32> -> vector<128x128xf32>
    %45 = arith.addf %38, %44 : vector<128x128xf32>
    %c0_43 = arith.constant 0 : index
    %c2_44 = arith.constant 2 : index
    %c0_45 = arith.constant 0 : index
    %c0_46 = arith.constant 0 : index
    %46 = vector.load %arg2[%c0_43, %c2_44, %c0_45, %c0_46] : memref<1x10x18x4xf32, #tpu.memory_space<vmem>>, vector<1x8x16x4xf32>
    %47 = vector.shape_cast %46 : vector<1x8x16x4xf32> to vector<8x16x4xf32>
    %48 = vector.shape_cast %47 : vector<8x16x4xf32> to vector<128x4xf32>
    %c6 = arith.constant 6 : index
    %c0_47 = arith.constant 0 : index
    %c0_48 = arith.constant 0 : index
    %49 = vector.load %arg3[%c6, %c0_47, %c0_48] : memref<9x4x128xf32, #tpu.memory_space<vmem>>, vector<1x4x128xf32>
    %50 = vector.shape_cast %49 : vector<1x4x128xf32> to vector<4x128xf32>
    %cst_49 = arith.constant dense<0.000000e+00> : vector<128x128xf32>
    %51 = tpu.matmul %48, %50, %cst_49 {dimension_numbers = #tpu.dot_dimension_numbers<[1], [0], [0], [1], [0, 0, 1, 1], [], []>} : vector<128x4xf32>, vector<4x128xf32>, vector<128x128xf32> -> vector<128x128xf32>
    %52 = arith.addf %45, %51 : vector<128x128xf32>
    %c0_50 = arith.constant 0 : index
    %c2_51 = arith.constant 2 : index
    %c1_52 = arith.constant 1 : index
    %c0_53 = arith.constant 0 : index
    %53 = vector.load %arg2[%c0_50, %c2_51, %c1_52, %c0_53] : memref<1x10x18x4xf32, #tpu.memory_space<vmem>>, vector<1x8x16x4xf32>
    %54 = vector.shape_cast %53 : vector<1x8x16x4xf32> to vector<8x16x4xf32>
    %55 = vector.shape_cast %54 : vector<8x16x4xf32> to vector<128x4xf32>
    %c7 = arith.constant 7 : index
    %c0_54 = arith.constant 0 : index
    %c0_55 = arith.constant 0 : index
    %56 = vector.load %arg3[%c7, %c0_54, %c0_55] : memref<9x4x128xf32, #tpu.memory_space<vmem>>, vector<1x4x128xf32>
    %57 = vector.shape_cast %56 : vector<1x4x128xf32> to vector<4x128xf32>
    %cst_56 = arith.constant dense<0.000000e+00> : vector<128x128xf32>
    %58 = tpu.matmul %55, %57, %cst_56 {dimension_numbers = #tpu.dot_dimension_numbers<[1], [0], [0], [1], [0, 0, 1, 1], [], []>} : vector<128x4xf32>, vector<4x128xf32>, vector<128x128xf32> -> vector<128x128xf32>
    %59 = arith.addf %52, %58 : vector<128x128xf32>
    %c0_57 = arith.constant 0 : index
    %c2_58 = arith.constant 2 : index
    %c2_59 = arith.constant 2 : index
    %c0_60 = arith.constant 0 : index
    %60 = vector.load %arg2[%c0_57, %c2_58, %c2_59, %c0_60] : memref<1x10x18x4xf32, #tpu.memory_space<vmem>>, vector<1x8x16x4xf32>
    %61 = vector.shape_cast %60 : vector<1x8x16x4xf32> to vector<8x16x4xf32>
    %62 = vector.shape_cast %61 : vector<8x16x4xf32> to vector<128x4xf32>
    %c8 = arith.constant 8 : index
    %c0_61 = arith.constant 0 : index
    %c0_62 = arith.constant 0 : index
    %63 = vector.load %arg3[%c8, %c0_61, %c0_62] : memref<9x4x128xf32, #tpu.memory_space<vmem>>, vector<1x4x128xf32>
    %64 = vector.shape_cast %63 : vector<1x4x128xf32> to vector<4x128xf32>
    %cst_63 = arith.constant dense<0.000000e+00> : vector<128x128xf32>
    %65 = tpu.matmul %62, %64, %cst_63 {dimension_numbers = #tpu.dot_dimension_numbers<[1], [0], [0], [1], [0, 0, 1, 1], [], []>} : vector<128x4xf32>, vector<4x128xf32>, vector<128x128xf32> -> vector<128x128xf32>
    %66 = arith.addf %59, %65 : vector<128x128xf32>
    %c0_64 = arith.constant 0 : index
    %c0_65 = arith.constant 0 : index
    %c0_66 = arith.constant 0 : index
    %67 = vector.load %arg6[%c0_64, %c0_65, %c0_66] : memref<1x1x128xf32, #tpu.memory_space<vmem>>, vector<1x1x128xf32>
    %cst_67 = arith.constant dense<0.000000e+00> : vector<128xf32>
    %68 = vector.multi_reduction <add>, %66, %cst_67 [0] : vector<128x128xf32> to vector<128xf32>
    %69 = vector.shape_cast %68 : vector<128xf32> to vector<1x128xf32>
    %70 = vector.shape_cast %69 : vector<1x128xf32> to vector<1x1x128xf32>
    %71 = arith.addf %67, %70 : vector<1x1x128xf32>
    %c0_68 = arith.constant 0 : index
    %c0_69 = arith.constant 0 : index
    %c0_70 = arith.constant 0 : index
    %72 = vector.load %arg6[%c0_68, %c0_69, %c0_70] : memref<1x1x128xf32, #tpu.memory_space<vmem>>, vector<1x1x128xf32>
    tpu.vector_store %arg6[%c0_68, %c0_69, %c0_70], %71 {strides = array<i32>} : memref<1x1x128xf32, #tpu.memory_space<vmem>>, vector<1x1x128xf32>,
    %c0_71 = arith.constant 0 : index
    %c0_72 = arith.constant 0 : index
    %c0_73 = arith.constant 0 : index
    %73 = vector.load %arg7[%c0_71, %c0_72, %c0_73] : memref<1x1x128xf32, #tpu.memory_space<vmem>>, vector<1x1x128xf32>
    %74 = arith.mulf %66, %66 : vector<128x128xf32>
    %cst_74 = arith.constant dense<0.000000e+00> : vector<128xf32>
    %75 = vector.multi_reduction <add>, %74, %cst_74 [0] : vector<128x128xf32> to vector<128xf32>
    %76 = vector.shape_cast %75 : vector<128xf32> to vector<1x128xf32>
    %77 = vector.shape_cast %76 : vector<1x128xf32> to vector<1x1x128xf32>
    %78 = arith.addf %73, %77 : vector<1x1x128xf32>
    %c0_75 = arith.constant 0 : index
    %c0_76 = arith.constant 0 : index
    %c0_77 = arith.constant 0 : index
    %79 = vector.load %arg7[%c0_75, %c0_76, %c0_77] : memref<1x1x128xf32, #tpu.memory_space<vmem>>, vector<1x1x128xf32>
    tpu.vector_store %arg7[%c0_75, %c0_76, %c0_77], %78 {strides = array<i32>} : memref<1x1x128xf32, #tpu.memory_space<vmem>>, vector<1x1x128xf32>,
    %80 = vector.shape_cast %66 : vector<128x128xf32> to vector<8x16x128xf32>
    %c0_78 = arith.constant 0 : index
    %c0_79 = arith.constant 0 : index
    %c0_80 = arith.constant 0 : index
    %c0_81 = arith.constant 0 : index
    %81 = vector.load %arg5[%c0_78, %c0_79, %c0_80, %c0_81] : memref<1x8x16x128xf32, #tpu.memory_space<vmem>>, vector<1x8x16x128xf32>
    %82 = vector.shape_cast %81 : vector<1x8x16x128xf32> to vector<8x16x128xf32>
    %83 = vector.shape_cast %80 : vector<8x16x128xf32> to vector<1x8x16x128xf32>
    tpu.vector_store %arg5[%c0_78, %c0_79, %c0_80, %c0_81], %83 {strides = array<i32>} : memref<1x8x16x128xf32, #tpu.memory_space<vmem>>, vector<1x8x16x128xf32>,
    return
  }
  func.func @transform_0(%arg0: i32, %arg1: i32) -> (i32, i32, i32, i32) {
    %c2_i32 = arith.constant 2 : i32
    %0 = arith.muli %arg0, %c2_i32 : i32
    %1 = arith.addi %0, %arg1 : i32
    %c0_i32 = arith.constant 0 : i32
    %c0_i32_0 = arith.constant 0 : i32
    %c0_i32_1 = arith.constant 0 : i32
    %c0_i32_2 = arith.constant 0 : i32
    return %1, %c0_i32, %c0_i32_0, %c0_i32_1 : i32, i32, i32, i32
  }
  func.func @transform_1(%arg0: i32, %arg1: i32) -> (i32, i32, i32) {
    %c0_i32 = arith.constant 0 : i32
    %c0_i32_0 = arith.constant 0 : i32
    %c0_i32_1 = arith.constant 0 : i32
    %c0_i32_2 = arith.constant 0 : i32
    return %c0_i32, %c0_i32_0, %c0_i32_1 : i32, i32, i32
  }
  func.func @transform_2(%arg0: i32, %arg1: i32) -> (i32, i32) {
    %c0_i32 = arith.constant 0 : i32
    %c0_i32_0 = arith.constant 0 : i32
    %c0_i32_1 = arith.constant 0 : i32
    return %c0_i32, %c0_i32_0 : i32, i32
  }
  func.func @transform_3(%arg0: i32, %arg1: i32) -> (i32, i32, i32, i32) {
    %c0_i32 = arith.constant 0 : i32
    %c0_i32_0 = arith.constant 0 : i32
    %c0_i32_1 = arith.constant 0 : i32
    return %arg0, %arg1, %c0_i32, %c0_i32_0 : i32, i32, i32, i32
  }
  func.func @transform_4(%arg0: i32, %arg1: i32) -> (i32, i32, i32) {
    %c0_i32 = arith.constant 0 : i32
    %c0_i32_0 = arith.constant 0 : i32
    %c0_i32_1 = arith.constant 0 : i32
    return %arg0, %c0_i32, %c0_i32_0 : i32, i32, i32
  }
  func.func @transform_5(%arg0: i32, %arg1: i32) -> (i32, i32, i32) {
    %c0_i32 = arith.constant 0 : i32
    %c0_i32_0 = arith.constant 0 : i32
    %c0_i32_1 = arith.constant 0 : i32
    return %arg0, %c0_i32, %c0_i32_0 : i32, i32, i32
  }
}

</mosaic_0001>

<bundles_post_ra>
// kernel: tpu_custom_call.1
= control target key start
LH: loop header
LB: loop body
LE: loop exit
PB: predicated region body
PF: predicated region fallthrough
CT: control target
= control target key end

     0   :  { %11 = vsyncpa [#allocation3], 0  ;;  %s4471_s0 = inlined_call_operand.vmem [shape: f32[4,10,18,4], index: 0, kind: input, shape index: {}]   ;;  %s4472_s1 = inlined_call_operand.vmem [shape: f32[9,4,128], index: 1, kind: input, shape index: {}]   ;;  %s4473_s2 = inlined_call_operand.vmem [shape: f32[1,128], index: 2, kind: input, shape index: {}]   ;;  %s4474_s3 = inlined_call_operand.hbm [shape: f32[2,16,16,128], index: 3, kind: output, shape index: {0}]   ;;  %s4475_s4 = inlined_call_operand.hbm [shape: f32[2,1,128], index: 4, kind: output, shape index: {1}]   ;;  %s4476_s5 = inlined_call_operand.hbm [shape: f32[2,1,128], index: 5, kind: output, shape index: {2}]  }
   0x1   :  { %13 = vsyncpa [#allocation3 + $0x1], 0 }
   0x2   :  { %14 = vsyncpa [#allocation5], 0 }
   0x3   :  { %16 = vsyncpa [#allocation5 + $0x1], 0  ;;  %s3695_s18 = smov 0   ;;  %s3697_s19 = smov 0  }
   0x4   :  { %s3699_s20 = smov 0   ;;  %s3701_s2 = smov 0  }
   0x5   :  { %s3703_s21 = smov 0   ;;  %s3705_s22 = smov 0  }
   0x6   :  { %s3707_s23 = smov 0   ;;  %s3709_s24 = smov 0  }
   0x7   :  { %s3711_s25 = smov 0   ;;  %s3713_s26 = smov 0  }
   0x8   :  { %s3715_s27 = smov 0  }
   0x9 LB: > { %4483 = sst [smem:[#allocation9_spill]] %s3649_s25  ;;  %s4478_s28 = sadd.s32 4294967295, %s3657_s27   ;;  %s3657_s27 = sphi %s3715_s27, %s22_s27   ;;  %s3653_s26 = sphi %s3713_s26, %s4498_s26   ;;  %s3649_s25 = sphi %s3711_s25, %s4497_s25   ;;  %s3645_s24 = sphi %s3709_s24, %s4496_s24   ;;  %s3641_s23 = sphi %s3707_s23, %s4495_s23   ;;  %s3637_s22 = sphi %s3705_s22, %s4504_s22   ;;  %s3633_s21 = sphi %s3703_s21, %s4503_s21   ;;  %s3629_s2 = sphi %s3701_s2, %s4502_s2   ;;  %s3625_s20 = sphi %s3699_s20, %s4501_s20   ;;  %s3621_s19 = sphi %s3697_s19, %s4500_s19   ;;  %s3617_s18 = sphi %s3695_s18, %s4499_s18  }
   0xa   : > { %4484 = sst [smem:[#allocation10_spill]] %s3653_s26  ;;  %s4477_s29 = sadd.s32 4294967294, %s3657_s27  }
   0xb   : > { %s31_s30 = sadd.s32 1, %s3649_s25  ;;  %s34_s6 = sadd.s32 1, %s3653_s26 }
   0xc   : > { %p32_p0 = scmp.ge.s32.totalorder %s31_s30, 2  ;;  %s115_s7 = sadd.s32 1, %s3637_s22 }
   0xd   : > { %p125_p1 = scmp.ne.s32.totalorder %s3637_s22, %s3633_s21  ;;  %p3759_p2 = scmp.eq.s32.totalorder %s4478_s28, 3 }
   0xe   : > { %s4506_s30 = smov (%p32_p0, %s31_s30), 0  ;;  %s4508_s6 = smov (!%p32_p0, %s34_s6), %s3653_s26 }
   0xf   : > { %4486 = sst [smem:[#allocation11_spill]] %s4506_s30  ;;  %s111_s9 = ssub.s32 %s3649_s25, %s4506_s30 }
  0x10   : > { %p3770_p3 = por %p3759_p2, %p125_p1  ;;  %p36_p4 = scmp.ge.s32.totalorder %s4508_s6, 2 }
  0x11   : > { %p131_p5 = scmp.ne.s32.totalorder %s3633_s21, %s3629_s2  ;;  %p3778_p6 = scmp.eq.s32.totalorder %s4477_s29, 3 }
  0x12   : > { %s141_s12 = sadd.s32 1, %s3625_s20  ;;  %s4510_s6 = smov (%p36_p4, %s4508_s6), 0 }
  0x13   : > { %4489 = sst [smem:[#allocation12_spill]] %s4510_s6  ;;  %p3787_p7 = por %p3778_p6, %p131_p5 }
  0x14   : > { %p151_p8 = scmp.ne.s32.totalorder %s3625_s20, %s3621_s19  ;;  %s110_s14 = ssub.s32 %s3653_s26, %s4510_s6 }
  0x15   : > { %p157_p9 = scmp.ne.s32.totalorder %s3621_s19, %s3617_s18  ;;  %s112_s15 = sor.u32 %s111_s9, %s110_s14 }
  0x16   : > { %p139_p10 = scmp.eq.s32.totalorder %s110_s14, 0  ;;  %p113_p11 = scmp.eq.s32.totalorder %s112_s15, 0 }
  0x17   : > { %p3799_p12 = por %p151_p8, %p3759_p2  ;;  %p3811_p13 = por %p157_p9, %p3778_p6 }
  0x18   : > { %s3804_s17 = scalar_select %p139_p10, %s3625_s20, %s141_s12  }
  0x19   : > { %s3807_s29 = scalar_select %p113_p11, %s3637_s22, %s115_s7  }
  0x1a   : > { %p2581_p0 = scmp.ge.s32.totalorder %s3657_s27, 1  ;;  %p220_p1 = scmp.lt.s32.totalorder %s3657_s27, 5 }
  0x1c   : > { %p221_p4 = pnand %p2581_p0, %p220_p1 }
  0x1d   : > { %s243_s18 = sand.u32 (!%p221_p4), 1, %s3633_s21   ;;  %s250_s8 = sand.u32 (!%p221_p4), 1, %s3621_s19  }
  0x1e   : > { %224 = sbr.rel (%p221_p4) target bundleno = 469 (0x1d5), region = 32  ;;  %s2582_s9 = sshll.u32 (!%p221_p4), %s243_s18, 7 }
  0x1f   : > { %s2583_s7 = sshll.u32 (!%p221_p4), %s3645_s24, 1  ;;  %s3828_s30 = scalar_lea.vmem (!%p221_p4), [#allocation2], %s2582_s9 }
  0x20   : > { %s259_s12 = sadd.s32 (!%p221_p4), %s3641_s23, %s2583_s7  ;;  %s3830_s26 = scalar_lea.vmem (!%p221_p4), [#allocation4], %s250_s8 }
  0x21   : > { %p260_p2 = scmp.lt.s32.totalorder (!%p221_p4), %s259_s12, 3  ;;  %s3832_s25 = scalar_lea.vmem (!%p221_p4), [#allocation6], %s250_s8 }
  0x22   : > { %p2585_p5 = scmp.ne.s32.totalorder (!%p221_p4), %s3641_s23, 0 }
  0x25   : > { %s4512_s12 = smov (!%p260_p2, %s259_s12), 3  ;;  %271 = sbr.rel (%p2585_p5) target bundleno = 44 (0x2c), region = 36 }
  0x26   : > { %s3370_s11 = smul.u32 240, %s4512_s12  ;;  %v3659_v0 = vmov (!%p2585_p5), 0.0  }
  0x27   : > { %272 = vst [vmem:[%s3830_s26] sm:$0x1] (!%p2585_p5), %v3659_v0  ;;  %273 = vst [vmem:[%s3832_s25] sm:$0x1] (!%p2585_p5), %v3659_v0 }
  0x28   : > { %s3826_s6 = scalar_lea.vmem %s4471_s0, %s3370_s11 }
  0x2c PF: > { %v2586_v1 = vld [vmem:[%s4472_s1 + $0x4] sm:$0xf]  ;;  %vm358_vm0 = vcmask 1043456   ;;  %v3843_v2 = vld [vmem:[%s4472_s1 + $0x10] sm:$0xf]  ;;  %vm309_vm1 = vcmask 31744  }
  0x2d   : > { %v291_v3 = vld [vmem:[%s3826_s6 + $0x1] sm:$0xff]  ;;  %3006 = vmatprep.subr.msk.mxu1 %vm358_vm0, %v2586_v1  ;;  %3110 = vmatprep.subr.msk.mxu0 %vm358_vm0, %v3843_v2  ;;  %v2673_v4 = vld [vmem:[%s3826_s6 + $0x19] sm:$0xff]  ;;  %v292_v5 = vld [vmem:[%s3826_s6 + $0x9] sm:$0xff]  ;;  %s2846_s11 = sshll.u32 %s3645_s24, 5  ;;  %s2420_s15 = sshll.u32 %s3828_s30, 4  ;;  %s4328_s15 = int_to_ptr.vmem [resolvable:$true] %s2420_s15 }
  0x2e   : > { %v290_v6 = vld [vmem:[%s4472_s1] sm:$0xf]  ;;  %3007 = vmatpush3.msk.msra.mxu1 %vm358_vm0, %v2586_v1  ;;  %3008 = vmatprep.mubr.msk.f32.mxu1 %vm309_vm1, %v291_v3  ;;  %v2723_v8 = vld [vmem:[%s4472_s1 + $0x14] sm:$0xf]  ;;  %v2757_v10 = vld [vmem:[%s4472_s1 + $0x18] sm:$0xf] }
  0x2f   : > { %v2674_v7 = vld [vmem:[%s3826_s6 + $0x21] sm:$0xff]  ;;  %3111 = vmatpush3.msk.msra.mxu0 %vm358_vm0, %v3843_v2  ;;  %3112 = vmatprep.mubr.msk.f32.mxu0 %vm309_vm1, %v2673_v4  ;;  %v3866_v9 = vld [vmem:[%s3826_s6 + $0x31] sm:$0xff]  ;;  %v3876_v11 = vld [vmem:[%s3826_s6 + $0x39] sm:$0xff]  ;;  %s4334_s9 = scalar_lea.sflag [#allocation3], %s243_s18 }
  0x30   : > { %3009 = vmatmul.mubr.msk.f32.vlgmr.msra.gmra.mrb[0].mxu1 %vm309_vm1, %v292_v5  ;;  %3032 = vmatprep.subr.msk.mxu1 %vm358_vm0, %v290_v6  ;;  %v3882_v12 = vld [vmem:[%s3826_s6 + $0x49] sm:$0xff]  ;;  %v3893_v13 = vld [vmem:[%s3826_s6 + $0x51] sm:$0xff]  ;;  %v3899_v15 = vld [vmem:[%s3826_s6 + $0x61] sm:$0xff] }
  0x31   : > { %3113 = vmatmul.mubr.msk.f32.vlgmr.msra.gmra.mrb[0].mxu0 %vm309_vm1, %v2674_v7  ;;  %3136 = vmatprep.subr.msk.mxu0 %vm358_vm0, %v2723_v8  ;;  %v2621_v14 = vld [vmem:[%s4472_s1 + $0x8] sm:$0xf]  ;;  %v3914_v17 = vld [vmem:[%s3826_s6 + $0x1a] sm:$0xff]  ;;  %v3931_v20 = vld [vmem:[%s3826_s6 + $0x32] sm:$0xff] }
  0x32   : > { %3033 = vmatpush3.msk.msra.mxu1 %vm358_vm0, %v290_v6  ;;  %3137 = vmatpush3.msk.msra.mxu0 %vm358_vm0, %v2723_v8  ;;  %v3911_v16 = vld [vmem:[%s3826_s6 + $0x69] sm:$0xff]  ;;  %v3928_v19 = vld [vmem:[%s3826_s6 + $0x79] sm:$0xff]  ;;  %v3945_v22 = vld [vmem:[%s3826_s6 + $0x81] sm:$0xff] }
  0x33   : > { %3011 = vmatprep.mubr.msk.f32.mxu1 %vm309_vm1, %v2673_v4  ;;  %3115 = vmatprep.mubr.msk.f32.mxu0 %vm309_vm1, %v3866_v9  ;;  %v3925_v18 = vld [vmem:[%s3826_s6 + $0x22] sm:$0xff]  ;;  %v3938_v21 = vld [vmem:[%s4472_s1 + $0x1c] sm:$0xf]  ;;  %v3954_v24 = vld [vmem:[%s3826_s6 + $0x91] sm:$0xff] }
  0x34   : > { %3012 = vmatmul.mubr.msk.f32.gmra.mrb[2].mxu1 %vm309_vm1, %v2674_v7  ;;  %3162 = vmatprep.subr.msk.mxu0 %vm358_vm0, %v2757_v10  ;;  %v3951_v23 = vld [vmem:[%s3826_s6 + $0x3a] sm:$0xff]  ;;  %v3957_v25 = vld [vmem:[%s3826_s6 + $0x4a] sm:$0xff]  ;;  %v3973_v27 = vld [vmem:[%s3826_s6 + $0x52] sm:$0xff] }
  0x35   : > { %3116 = vmatmul.mubr.msk.f32.gmra.mrb[2].mxu0 %vm309_vm1, %v3876_v11  ;;  %3014 = vmatprep.mubr.msk.f32.mxu1 %vm309_vm1, %v3866_v9  ;;  %v3968_v26 = vld [vmem:[%s3826_s6 + $0x99] sm:$0xff]  ;;  %v3976_v28 = vld [vmem:[%s3826_s6 + $0xa9] sm:$0xff]  ;;  %v3988_v30 = vld [vmem:[%s3826_s6 + $0xb1] sm:$0xff] }
  0x36   : > { %3118 = vmatprep.mubr.msk.f32.mxu0 %vm309_vm1, %v3882_v12  ;;  %3058 = vmatprep.subr.msk.mxu1 %vm358_vm0, %v2621_v14  ;;  %v3979_v29 = vld [vmem:[%s3826_s6 + $0x62] sm:$0xff]  ;;  %v3993_v31 = vld [vmem:[%s3826_s6 + $0x6a] sm:$0xff]  ;;  %v3997_v33 = vld [vmem:[%s3826_s6 + $0x7a] sm:$0xff] }
  0x37   : > { %v274_v32 = vld [vmem:[%s3826_s6] sm:$0xff]  ;;  %v275_v34 = vld [vmem:[%s3826_s6 + $0x8] sm:$0xff]  ;;  %v4011_v36 = vld [vmem:[%s3826_s6 + $0x18] sm:$0xff] }
  0x38   : > { %3015 = vmatmul.mubr.msk.f32.gmra.mrb[4].mxu1 %vm309_vm1, %v3876_v11  ;;  %v4008_v35 = vld [vmem:[%s3826_s6 + $0x82] sm:$0xff]  ;;  %v4014_v37 = vld [vmem:[%s3826_s6 + $0x92] sm:$0xff]  ;;  %v2655_v38 = vld [vmem:[%s4472_s1 + $0xc] sm:$0xf] }
  0x39   : > { %3119 = vmatmul.mubr.msk.f32.gmra.mrb[4].mxu0 %vm309_vm1, %v3893_v13  ;;  %3017 = vmatprep.mubr.msk.f32.mxu1 %vm309_vm1, %v3882_v12  ;;  %v4024_v39 = vld [vmem:[%s3826_s6 + $0x20] sm:$0xff]  ;;  %v4034_v41 = vld [vmem:[%s3826_s6 + $0x30] sm:$0xff]  ;;  %v4047_v43 = vld [vmem:[%s3826_s6 + $0x38] sm:$0xff] }
  0x3a   : > { %3121 = vmatprep.mubr.msk.f32.mxu0 %vm309_vm1, %v3899_v15  ;;  %v4031_v40 = vld [vmem:[%s3826_s6 + $0x9a] sm:$0xff]  ;;  %v4037_v42 = vld [vmem:[%s3826_s6 + $0xaa] sm:$0xff]  ;;  %v4052_v44 = vld [vmem:[%s3826_s6 + $0xb2] sm:$0xff] }
  0x3b   : > { %v4055_v45 = vld [vmem:[%s3826_s6 + $0x48] sm:$0xff]  ;;  %v4067_v47 = vld [vmem:[%s3826_s6 + $0x50] sm:$0xff]  ;;  %v4075_v49 = vld [vmem:[%s3826_s6 + $0x60] sm:$0xff] }
  0x3c   : > { %3018 = vmatmul.mubr.msk.f32.gmra.mrb[6].mxu1 %vm309_vm1, %v3893_v13  ;;  %v4058_v46 = vld [vmem:[%s3826_s6 + $0xc2] sm:$0xff]  ;;  %v4072_v48 = vld [vmem:[%s3826_s6 + $0xca] sm:$0xff]  ;;  %v4089_v51 = vld [vmem:[%s3826_s6 + $0x78] sm:$0xff] }
  0x3d   : > { %3122 = vmatmul.mubr.msk.f32.gmra.mrb[6].mxu0 %vm309_vm1, %v3911_v16  ;;  %3020 = vmatprep.mubr.msk.f32.mxu1 %vm309_vm1, %v3899_v15  ;;  %v4084_v50 = vld [vmem:[%s3826_s6 + $0x68] sm:$0xff]  ;;  %v2825_v52 = vld [vmem:[%s4472_s1 + $0x20] sm:$0xf]  ;;  %v4108_v54 = vld [vmem:[%s3826_s6 + $0x90] sm:$0xff] }
  0x3e   : > { %3138 = vmatprep.mubr.msk.f32.mxu0 %vm309_vm1, %v3914_v17  ;;  %v4101_v53 = vld [vmem:[%s3826_s6 + $0x80] sm:$0xff]  ;;  %v4118_v55 = vld [vmem:[%s3826_s6 + $0x98] sm:$0xff]  ;;  %v4123_v56 = vld [vmem:[%s3826_s6 + $0xa8] sm:$0xff] }
  0x3f   : > { %v4132_v57 = vld [vmem:[%s3826_s6 + $0xb0] sm:$0xff]  ;;  %v703_v58 = vld [vmem:[%s3826_s6 + $0x2] sm:$0xff]  ;;  %v2755_v62 = vld [vmem:[%s3826_s6 + $0xd8] sm:$0xff] }
  0x40   : > { %3021 = vmatmul.mubr.msk.f32.gmra.mrb[8].mxu1 %vm309_vm1, %v3911_v16  ;;  %v704_v59 = vld [vmem:[%s3826_s6 + $0xa] sm:$0xff]  ;;  %v4154_v60 = vld [vmem:[%s3826_s6 + $0xc0] sm:$0xff] }
  0x41   : > { %3139 = vmatmul.mubr.msk.f32.vlgmr.msra.gmra.mrb[0].mxu0 %vm309_vm1, %v3925_v18  ;;  %3023 = vmatprep.mubr.msk.f32.mxu1 %vm309_vm1, %v3928_v19  ;;  %v2754_v61 = vld [vmem:[%s3826_s6 + $0xc8] sm:$0xff]  ;;  %v2756_v63 = vld [vmem:[%s3826_s6 + $0xe0] sm:$0xff] }
  0x42   : > { %3163 = vmatpush3.msk.msra.mxu0 %vm358_vm0, %v2757_v10  ;;  %3141 = vmatprep.mubr.msk.f32.mxu0 %vm309_vm1, %v3931_v20  ;;  %v2787_v0 = vld [vmem:[%s3826_s6 + $0xc1] sm:$0xff]  ;;  %v2788_v1 = vld [vmem:[%s3826_s6 + $0xc9] sm:$0xff] }
  0x43   : > { %3188 = vmatprep.subr.msk.mxu0 %vm358_vm0, %v3938_v21  ;;  %v2790_v3 = vld [vmem:[%s3826_s6 + $0xe1] sm:$0xff] }
  0x44   : > { %3024 = vmatmul.mubr.msk.f32.gmra.mrb[10].mxu1 %vm309_vm1, %v3945_v22  ;;  %v2823_v4 = vld [vmem:[%s3826_s6 + $0xda] sm:$0xff]  ;;  %v2824_v5 = vld [vmem:[%s3826_s6 + $0xe2] sm:$0xff] }
  0x45   : > { %3142 = vmatmul.mubr.msk.f32.gmra.mrb[2].mxu0 %vm309_vm1, %v3951_v23  ;;  %3026 = vmatprep.mubr.msk.f32.mxu1 %vm309_vm1, %v3954_v24 }
  0x46   : > { %3144 = vmatprep.mubr.msk.f32.mxu0 %vm309_vm1, %v3957_v25 }
  0x48   : > { %3027 = vmatmul.mubr.msk.f32.gmra.mrb[12].mxu1 %vm309_vm1, %v3968_v26 }
  0x49   : > { %3145 = vmatmul.mubr.msk.f32.gmra.mrb[4].mxu0 %vm309_vm1, %v3973_v27  ;;  %3029 = vmatprep.mubr.msk.f32.mxu1 %vm309_vm1, %v3976_v28 }
  0x4a   : > { %3147 = vmatprep.mubr.msk.f32.mxu0 %vm309_vm1, %v3979_v29 }
  0x4c   : > { %3030 = vmatmul.mubr.msk.f32.gmra.mrb[14].mxu1 %vm309_vm1, %v3988_v30 }
  0x4d   : > { %3148 = vmatmul.mubr.msk.f32.gmra.mrb[6].mxu0 %vm309_vm1, %v3993_v31  ;;  %3034 = vmatprep.mubr.msk.f32.mxu1 %vm309_vm1, %v274_v32 }
  0x4e   : > { %3150 = vmatprep.mubr.msk.f32.mxu0 %vm309_vm1, %v3997_v33 }
  0x50   : > { %3035 = vmatmul.mubr.msk.f32.vlgmr.msra.gmra.mrb[0].mxu1 %vm309_vm1, %v275_v34 }
  0x51   : > { %3151 = vmatmul.mubr.msk.f32.gmra.mrb[8].mxu0 %vm309_vm1, %v4008_v35  ;;  %3059 = vmatpush3.msk.msra.mxu1 %vm358_vm0, %v2621_v14 }
  0x52   : > { %3037 = vmatprep.mubr.msk.f32.mxu1 %vm309_vm1, %v4011_v36  ;;  %3153 = vmatprep.mubr.msk.f32.mxu0 %vm309_vm1, %v4014_v37 }
  0x53   : > { %3084 = vmatprep.subr.msk.mxu1 %vm358_vm0, %v2655_v38 }
  0x54   : > { %3038 = vmatmul.mubr.msk.f32.gmra.mrb[2].mxu1 %vm309_vm1, %v4024_v39 }
  0x55   : > { %3154 = vmatmul.mubr.msk.f32.gmra.mrb[10].mxu0 %vm309_vm1, %v4031_v40  ;;  %3040 = vmatprep.mubr.msk.f32.mxu1 %vm309_vm1, %v4034_v41 }
  0x56   : > { %3156 = vmatprep.mubr.msk.f32.mxu0 %vm309_vm1, %v4037_v42 }
  0x58   : > { %3041 = vmatmul.mubr.msk.f32.gmra.mrb[4].mxu1 %vm309_vm1, %v4047_v43 }
  0x59   : > { %3157 = vmatmul.mubr.msk.f32.gmra.mrb[12].mxu0 %vm309_vm1, %v4052_v44  ;;  %3043 = vmatprep.mubr.msk.f32.mxu1 %vm309_vm1, %v4055_v45 }
  0x5a   : > { %3159 = vmatprep.mubr.msk.f32.mxu0 %vm309_vm1, %v4058_v46 }
  0x5c   : > { %3044 = vmatmul.mubr.msk.f32.gmra.mrb[6].mxu1 %vm309_vm1, %v4067_v47 }
  0x5d   : > { %3160 = vmatmul.mubr.msk.f32.gmra.mrb[14].mxu0 %vm309_vm1, %v4072_v48  ;;  %3046 = vmatprep.mubr.msk.f32.mxu1 %vm309_vm1, %v4075_v49 }
  0x5e   : > { %3164 = vmatprep.mubr.msk.f32.mxu0 %vm309_vm1, %v4034_v41 }
  0x60   : > { %3047 = vmatmul.mubr.msk.f32.gmra.mrb[8].mxu1 %vm309_vm1, %v4084_v50 }
  0x61   : > { %3165 = vmatmul.mubr.msk.f32.vlgmr.msra.gmra.mrb[0].mxu0 %vm309_vm1, %v4047_v43  ;;  %3049 = vmatprep.mubr.msk.f32.mxu1 %vm309_vm1, %v4089_v51 }
  0x62   : > { %3189 = vmatpush3.msk.msra.mxu0 %vm358_vm0, %v3938_v21  ;;  %3167 = vmatprep.mubr.msk.f32.mxu0 %vm309_vm1, %v4055_v45 }
  0x63   : > { %3214 = vmatprep.subr.msk.mxu0 %vm358_vm0, %v2825_v52 }
  0x64   : > { %3050 = vmatmul.mubr.msk.f32.gmra.mrb[10].mxu1 %vm309_vm1, %v4101_v53 }
  0x65   : > { %3168 = vmatmul.mubr.msk.f32.gmra.mrb[2].mxu0 %vm309_vm1, %v4067_v47  ;;  %3052 = vmatprep.mubr.msk.f32.mxu1 %vm309_vm1, %v4108_v54 }
  0x66   : > { %3170 = vmatprep.mubr.msk.f32.mxu0 %vm309_vm1, %v4075_v49 }
  0x68   : > { %3053 = vmatmul.mubr.msk.f32.gmra.mrb[12].mxu1 %vm309_vm1, %v4118_v55 }
  0x69   : > { %3171 = vmatmul.mubr.msk.f32.gmra.mrb[4].mxu0 %vm309_vm1, %v4084_v50  ;;  %3055 = vmatprep.mubr.msk.f32.mxu1 %vm309_vm1, %v4123_v56 }
  0x6a   : > { %3173 = vmatprep.mubr.msk.f32.mxu0 %vm309_vm1, %v4089_v51 }
  0x6c   : > { %3056 = vmatmul.mubr.msk.f32.gmra.mrb[14].mxu1 %vm309_vm1, %v4132_v57 }
  0x6d   : > { %3174 = vmatmul.mubr.msk.f32.gmra.mrb[6].mxu0 %vm309_vm1, %v4101_v53  ;;  %3060 = vmatprep.mubr.msk.f32.mxu1 %vm309_vm1, %v703_v58 }
  0x6e   : > { %3176 = vmatprep.mubr.msk.f32.mxu0 %vm309_vm1, %v4108_v54 }
  0x70   : > { %3061 = vmatmul.mubr.msk.f32.vlgmr.msra.gmra.mrb[0].mxu1 %vm309_vm1, %v704_v59 }
  0x71   : > { %3177 = vmatmul.mubr.msk.f32.gmra.mrb[8].mxu0 %vm309_vm1, %v4118_v55  ;;  %3085 = vmatpush3.msk.msra.mxu1 %vm358_vm0, %v2655_v38 }
  0x72   : > { %3063 = vmatprep.mubr.msk.f32.mxu1 %vm309_vm1, %v3914_v17  ;;  %3179 = vmatprep.mubr.msk.f32.mxu0 %vm309_vm1, %v4123_v56 }
  0x73   : > { %3240 = vmatprep.subr.msk.mxu1 %vm358_vm0, %v3843_v2 }
  0x74   : > { %3064 = vmatmul.mubr.msk.f32.gmra.mrb[2].mxu1 %vm309_vm1, %v3925_v18 }
  0x75   : > { %3180 = vmatmul.mubr.msk.f32.gmra.mrb[10].mxu0 %vm309_vm1, %v4132_v57  ;;  %3066 = vmatprep.mubr.msk.f32.mxu1 %vm309_vm1, %v3931_v20 }
  0x76   : > { %3182 = vmatprep.mubr.msk.f32.mxu0 %vm309_vm1, %v4154_v60 }
  0x78   : > { %3067 = vmatmul.mubr.msk.f32.gmra.mrb[4].mxu1 %vm309_vm1, %v3951_v23 }
  0x79   : > { %3183 = vmatmul.mubr.msk.f32.gmra.mrb[12].mxu0 %vm309_vm1, %v2754_v61  ;;  %3069 = vmatprep.mubr.msk.f32.mxu1 %vm309_vm1, %v3957_v25 }
  0x7a   : > { %3185 = vmatprep.mubr.msk.f32.mxu0 %vm309_vm1, %v2755_v62 }
  0x7c   : > { %3070 = vmatmul.mubr.msk.f32.gmra.mrb[6].mxu1 %vm309_vm1, %v3973_v27 }
  0x7d   : > { %3186 = vmatmul.mubr.msk.f32.gmra.mrb[14].mxu0 %vm309_vm1, %v2756_v63  ;;  %3072 = vmatprep.mubr.msk.f32.mxu1 %vm309_vm1, %v3979_v29 }
  0x7e   : > { %3190 = vmatprep.mubr.msk.f32.mxu0 %vm309_vm1, %v3866_v9 }
  0x80   : > { %3073 = vmatmul.mubr.msk.f32.gmra.mrb[8].mxu1 %vm309_vm1, %v3993_v31 }
  0x81   : > { %3191 = vmatmul.mubr.msk.f32.vlgmr.msra.gmra.mrb[0].mxu0 %vm309_vm1, %v3876_v11  ;;  %3075 = vmatprep.mubr.msk.f32.mxu1 %vm309_vm1, %v3997_v33 }
  0x82   : > { %3215 = vmatpush3.msk.msra.mxu0 %vm358_vm0, %v2825_v52  ;;  %3193 = vmatprep.mubr.msk.f32.mxu0 %vm309_vm1, %v3882_v12 }
  0x84   : > { %3076 = vmatmul.mubr.msk.f32.gmra.mrb[10].mxu1 %vm309_vm1, %v4008_v35 }
  0x85   : > { %3194 = vmatmul.mubr.msk.f32.gmra.mrb[2].mxu0 %vm309_vm1, %v3893_v13  ;;  %3078 = vmatprep.mubr.msk.f32.mxu1 %vm309_vm1, %v4014_v37 }
  0x86   : > { %3196 = vmatprep.mubr.msk.f32.mxu0 %vm309_vm1, %v3899_v15 }
  0x88   : > { %3079 = vmatmul.mubr.msk.f32.gmra.mrb[12].mxu1 %vm309_vm1, %v4031_v40 }
  0x89   : > { %3197 = vmatmul.mubr.msk.f32.gmra.mrb[4].mxu0 %vm309_vm1, %v3911_v16  ;;  %3081 = vmatprep.mubr.msk.f32.mxu1 %vm309_vm1, %v4037_v42 }
  0x8a   : > { %3199 = vmatprep.mubr.msk.f32.mxu0 %vm309_vm1, %v3928_v19 }
  0x8c   : > { %3082 = vmatmul.mubr.msk.f32.gmra.mrb[14].mxu1 %vm309_vm1, %v4052_v44 }
  0x8d   : > { %3200 = vmatmul.mubr.msk.f32.gmra.mrb[6].mxu0 %vm309_vm1, %v3945_v22  ;;  %3086 = vmatprep.mubr.msk.f32.mxu1 %vm309_vm1, %v4011_v36 }
  0x8e   : > { %3202 = vmatprep.mubr.msk.f32.mxu0 %vm309_vm1, %v3954_v24 }
  0x90   : > { %3087 = vmatmul.mubr.msk.f32.vlgmr.msra.gmra.mrb[0].mxu1 %vm309_vm1, %v4024_v39 }
  0x91   : > { %3203 = vmatmul.mubr.msk.f32.gmra.mrb[8].mxu0 %vm309_vm1, %v3968_v26  ;;  %3241 = vmatpush3.msk.msra.mxu1 %vm358_vm0, %v3843_v2  ;;  %v2789_v2 = vld [vmem:[%s3826_s6 + $0xd9] sm:$0xff]  ;;  %s2852_s6 = sshll.u32 %s3641_s23, 4 }
  0x92   : > { %3089 = vmatprep.mubr.msk.f32.mxu1 %vm309_vm1, %v4034_v41  ;;  %3205 = vmatprep.mubr.msk.f32.mxu0 %vm309_vm1, %v3976_v28  ;;  %s2417_s14 = sadd.s32 %s2852_s6, %s2846_s11  ;;  %s3479_s6 = scalar_lea.vmem %s4328_s15, 2048 }
  0x93   : > { %s2847_s23 = sshll.u32 %s2417_s14, 7  ;;  %p3480_p6 = scmp.ne.s32.totalorder %s4328_s15, %s3479_s6 }
  0x94   : > { %3090 = vmatmul.mubr.msk.f32.gmra.mrb[2].mxu1 %vm309_vm1, %v4047_v43  ;;  %s4326_s8 = scalar_lea.hbm %s4474_s3, %s2847_s23  ;;  %s3660_s11 = smov [#allocation2]  }
  0x95   : > { %3206 = vmatmul.mubr.msk.f32.gmra.mrb[10].mxu0 %vm309_vm1, %v3988_v30  ;;  %3092 = vmatprep.mubr.msk.f32.mxu1 %vm309_vm1, %v4055_v45  ;;  %p3481_p8 = pnand %p3480_p6, %p3770_p3  ;;  %s3483_s14 = sshll.u32 %s3660_s11, 4  ;;  %s3484_s14 = int_to_ptr.vmem [resolvable:$false] %s3483_s14 }
  0x96   : > { %3208 = vmatprep.mubr.msk.f32.mxu0 %vm309_vm1, %v2787_v0  ;;  %s3485_s23 = scalar_lea.vmem %s3484_s14, 4096  ;;  %p3486_p10 = scmp.lt.s32.totalorder %s4328_s15, %s3484_s14 }
  0x97   : > { %p3482_p9 = pneg %p3481_p8  ;;  %p3487_p11 = scmp.lt.s32.totalorder %s3485_s23, %s3479_s6 }
  0x98   : > { %3093 = vmatmul.mubr.msk.f32.gmra.mrb[4].mxu1 %vm309_vm1, %v4067_v47 }
  0x99   : > { %3209 = vmatmul.mubr.msk.f32.gmra.mrb[12].mxu0 %vm309_vm1, %v2788_v1  ;;  %3095 = vmatprep.mubr.msk.f32.mxu1 %vm309_vm1, %v4075_v49  ;;  %p3488_p0 = por %p3487_p11, %p3486_p10 }
  0x9a   : > { %3211 = vmatprep.mubr.msk.f32.mxu0 %vm309_vm1, %v2789_v2 }
  0x9b   : > { %p3489_p1 = pnand %p3488_p0, %p3482_p9 }
  0x9c   : > { %3096 = vmatmul.mubr.msk.f32.gmra.mrb[6].mxu1 %vm309_vm1, %v4084_v50 }
  0x9d   : > { %3212 = vmatmul.mubr.msk.f32.gmra.mrb[14].mxu0 %vm309_vm1, %v2790_v3  ;;  %3098 = vmatprep.mubr.msk.f32.mxu1 %vm309_vm1, %v4089_v51 }
  0x9e   : > { %3216 = vmatprep.mubr.msk.f32.mxu0 %vm309_vm1, %v3931_v20 }
  0xa0   : > { %3099 = vmatmul.mubr.msk.f32.gmra.mrb[8].mxu1 %vm309_vm1, %v4101_v53 }
  0xa1   : > { %3217 = vmatmul.mubr.msk.f32.vlgmr.msra.gmra.mrb[0].mxu0 %vm309_vm1, %v3951_v23  ;;  %3101 = vmatprep.mubr.msk.f32.mxu1 %vm309_vm1, %v4108_v54 }
  0xa2   : > { %3219 = vmatprep.mubr.msk.f32.mxu0 %vm309_vm1, %v3957_v25 }
  0xa4   : > { %3102 = vmatmul.mubr.msk.f32.gmra.mrb[10].mxu1 %vm309_vm1, %v4118_v55 }
  0xa5   : > { %3220 = vmatmul.mubr.msk.f32.gmra.mrb[2].mxu0 %vm309_vm1, %v3973_v27  ;;  %3104 = vmatprep.mubr.msk.f32.mxu1 %vm309_vm1, %v4123_v56 }
  0xa6   : > { %3222 = vmatprep.mubr.msk.f32.mxu0 %vm309_vm1, %v3979_v29 }
  0xa8   : > { %3105 = vmatmul.mubr.msk.f32.gmra.mrb[12].mxu1 %vm309_vm1, %v4132_v57 }
  0xa9   : > { %3223 = vmatmul.mubr.msk.f32.gmra.mrb[4].mxu0 %vm309_vm1, %v3993_v31  ;;  %3107 = vmatprep.mubr.msk.f32.mxu1 %vm309_vm1, %v4154_v60 }
  0xaa   : > { %3225 = vmatprep.mubr.msk.f32.mxu0 %vm309_vm1, %v3997_v33 }
  0xac   : > { %3108 = vmatmul.mubr.msk.f32.gmra.mrb[14].mxu1 %vm309_vm1, %v2754_v61 }
  0xad   : > { %3226 = vmatmul.mubr.msk.f32.gmra.mrb[6].mxu0 %vm309_vm1, %v4008_v35  ;;  %3124 = vmatprep.mubr.msk.f32.mxu1 %vm309_vm1, %v3928_v19 }
  0xae   : > { %3228 = vmatprep.mubr.msk.f32.mxu0 %vm309_vm1, %v4014_v37 }
  0xb0   : > { %3125 = vmatmul.mubr.msk.f32.vlgmr.msra.gmra.mrb[8].mxu1 %vm309_vm1, %v3945_v22 }
  0xb1   : > { %3229 = vmatmul.mubr.msk.f32.gmra.mrb[8].mxu0 %vm309_vm1, %v4031_v40  ;;  %3127 = vmatprep.mubr.msk.f32.mxu1 %vm309_vm1, %v3954_v24 }
  0xb2   : > { %3231 = vmatprep.mubr.msk.f32.mxu0 %vm309_vm1, %v4037_v42 }
  0xb4   : > { %3128 = vmatmul.mubr.msk.f32.gmra.mrb[10].mxu1 %vm309_vm1, %v3968_v26 }
  0xb5   : > { %3232 = vmatmul.mubr.msk.f32.gmra.mrb[10].mxu0 %vm309_vm1, %v4052_v44  ;;  %3130 = vmatprep.mubr.msk.f32.mxu1 %vm309_vm1, %v3976_v28 }
  0xb6   : > { %3234 = vmatprep.mubr.msk.f32.mxu0 %vm309_vm1, %v4058_v46 }
  0xb8   : > { %3131 = vmatmul.mubr.msk.f32.gmra.mrb[12].mxu1 %vm309_vm1, %v3988_v30 }
  0xb9   : > { %3235 = vmatmul.mubr.msk.f32.gmra.mrb[12].mxu0 %vm309_vm1, %v4072_v48  ;;  %3133 = vmatprep.mubr.msk.f32.mxu1 %vm309_vm1, %v2787_v0 }
  0xba   : > { %3237 = vmatprep.mubr.msk.f32.mxu0 %vm309_vm1, %v2823_v4 }
  0xbc   : > { %3134 = vmatmul.mubr.msk.f32.gmra.mrb[14].mxu1 %vm309_vm1, %v2788_v1 }
  0xbd   : > { %3238 = vmatmul.mubr.msk.f32.gmra.mrb[14].mxu0 %vm309_vm1, %v2824_v5 }
 0x163   : > { %v3088_v6 = vpop.f32.mrb[0].mxu1 }
 0x164   : > { %v1069_v7 = vpop.f32.mrb[1].mxu1 }
 0x167   : > { %v3091_v8 = vpop.f32.mrb[2].mxu1 }
 0x168   : > { %v1079_v9 = vpop.f32.mrb[3].mxu1 }
 0x16b   : > { %v3094_v10 = vpop.f32.mrb[4].mxu1 }
 0x16c   : > { %v1089_v11 = vpop.f32.mrb[5].mxu1 }
 0x16f   : > { %v3097_v12 = vpop.f32.mrb[6].mxu1 }
 0x170   : > { %v1099_v13 = vpop.f32.mrb[7].mxu1 }
 0x174   : > { %v3218_v14 = vpop.f32.mrb[0].mxu0 }
 0x175   : > { %v3242_v15 = vadd.f32 %v3218_v14, %v3088_v6  ;;  %v2220_v16 = vpop.f32.mrb[1].mxu0 }
 0x176   : > { %v3243_v17 = vadd.f32 %v2220_v16, %v1069_v7 }
 0x177   : > { %v2341_v18 = vmul.f32 %v3242_v15, %v3242_v15  ;;  %2380 = vst [vmem:[%s3828_s30 + $0x8] sm:$0xff] %v3242_v15 }
 0x178   : > { %v2316_v19 = vadd.f32 %v3243_v17, %v3242_v15  ;;  %v2340_v20 = vmul.f32 %v3243_v17, %v3243_v17  ;;  %2379 = vst [vmem:[%s3828_s30] sm:$0xff] %v3243_v17  ;;  %v3221_v21 = vpop.f32.mrb[2].mxu0 }
 0x179   : > { %v3244_v22 = vadd.f32 %v3221_v21, %v3091_v8  ;;  %v2230_v23 = vpop.f32.mrb[3].mxu0 }
 0x17a   : > { %v2356_v24 = vadd.f32 %v2341_v18, %v2340_v20  ;;  %v3245_v25 = vadd.f32 %v2230_v23, %v1079_v9 }
 0x17b   : > { %2382 = vst [vmem:[%s3828_s30 + $0x18] sm:$0xff] %v3244_v22  ;;  %v2343_v31 = vmul.f32 %v3244_v22, %v3244_v22 }
 0x17c   : > { %v2317_v26 = vadd.f32 %v3245_v25, %v2316_v19  ;;  %v2342_v27 = vmul.f32 %v3245_v25, %v3245_v25  ;;  %2381 = vst [vmem:[%s3828_s30 + $0x10] sm:$0xff] %v3245_v25  ;;  %v3224_v28 = vpop.f32.mrb[4].mxu0 }
 0x17d   : > { %v3246_v29 = vadd.f32 %v3224_v28, %v3094_v10  ;;  %v2240_v30 = vpop.f32.mrb[5].mxu0 }
 0x17e   : > { %v2357_v32 = vadd.f32 %v2356_v24, %v2342_v27  ;;  %v3247_v33 = vadd.f32 %v2240_v30, %v1089_v11  ;;  %v2318_v34 = vadd.f32 %v3244_v22, %v2317_v26 }
 0x17f   : > { %2384 = vst [vmem:[%s3828_s30 + $0x28] sm:$0xff] %v3246_v29  ;;  %v2345_v41 = vmul.f32 %v3246_v29, %v3246_v29 }
 0x180   : > { %v2319_v35 = vadd.f32 %v3247_v33, %v2318_v34  ;;  %v2344_v36 = vmul.f32 %v3247_v33, %v3247_v33  ;;  %v2358_v37 = vadd.f32 %v2357_v32, %v2343_v31  ;;  %2383 = vst [vmem:[%s3828_s30 + $0x20] sm:$0xff] %v3247_v33  ;;  %v3227_v38 = vpop.f32.mrb[6].mxu0 }
 0x181   : > { %v3248_v39 = vadd.f32 %v3227_v38, %v3097_v12  ;;  %v2250_v40 = vpop.f32.mrb[7].mxu0 }
 0x182   : > { %v2359_v42 = vadd.f32 %v2358_v37, %v2344_v36  ;;  %v3249_v43 = vadd.f32 %v2250_v40, %v1099_v13  ;;  %v2320_v44 = vadd.f32 %v3246_v29, %v2319_v35 }
 0x183   : > { %2386 = vst [vmem:[%s3828_s30 + $0x38] sm:$0xff] %v3248_v39  ;;  %v3126_v45 = vpop.f32.mrb[8].mxu1  ;;  %v2347_v53 = vmul.f32 %v3248_v39, %v3248_v39 }
 0x184   : > { %v2321_v46 = vadd.f32 %v3249_v43, %v2320_v44  ;;  %v2346_v47 = vmul.f32 %v3249_v43, %v3249_v43  ;;  %v2360_v48 = vadd.f32 %v2359_v42, %v2345_v41  ;;  %2385 = vst [vmem:[%s3828_s30 + $0x30] sm:$0xff] %v3249_v43  ;;  %v3230_v49 = vpop.f32.mrb[8].mxu0  ;;  %v1339_v50 = vpop.f32.mrb[9].mxu1 }
 0x185   : > { %v3250_v51 = vadd.f32 %v3230_v49, %v3126_v45  ;;  %v2260_v52 = vpop.f32.mrb[9].mxu0 }
 0x186   : > { %v2361_v54 = vadd.f32 %v2360_v48, %v2346_v47  ;;  %v3251_v55 = vadd.f32 %v2260_v52, %v1339_v50  ;;  %v2322_v56 = vadd.f32 %v3248_v39, %v2321_v46 }
 0x187   : > { %2388 = vst [vmem:[%s3828_s30 + $0x48] sm:$0xff] %v3250_v51  ;;  %v3129_v57 = vpop.f32.mrb[10].mxu1  ;;  %v2349_v1 = vmul.f32 %v3250_v51, %v3250_v51 }
 0x188   : > { %v2323_v58 = vadd.f32 %v3251_v55, %v2322_v56  ;;  %v2348_v59 = vmul.f32 %v3251_v55, %v3251_v55  ;;  %v2362_v60 = vadd.f32 %v2361_v54, %v2347_v53  ;;  %2387 = vst [vmem:[%s3828_s30 + $0x40] sm:$0xff] %v3251_v55  ;;  %v3233_v61 = vpop.f32.mrb[10].mxu0  ;;  %v1349_v62 = vpop.f32.mrb[11].mxu1 }
 0x189   : > { %v3252_v63 = vadd.f32 %v3233_v61, %v3129_v57  ;;  %v2270_v0 = vpop.f32.mrb[11].mxu0 }
 0x18a   : > { %v2363_v2 = vadd.f32 %v2362_v60, %v2348_v59  ;;  %v3253_v3 = vadd.f32 %v2270_v0, %v1349_v62  ;;  %v2324_v4 = vadd.f32 %v3250_v51, %v2323_v58 }
 0x18b   : > { %2390 = vst [vmem:[%s3828_s30 + $0x58] sm:$0xff] %v3252_v63  ;;  %v3132_v5 = vpop.f32.mrb[12].mxu1  ;;  %v2351_v13 = vmul.f32 %v3252_v63, %v3252_v63 }
 0x18c   : > { %v2325_v6 = vadd.f32 %v3253_v3, %v2324_v4  ;;  %v2350_v7 = vmul.f32 %v3253_v3, %v3253_v3  ;;  %v2364_v8 = vadd.f32 %v2363_v2, %v2349_v1  ;;  %2389 = vst [vmem:[%s3828_s30 + $0x50] sm:$0xff] %v3253_v3  ;;  %v3236_v9 = vpop.f32.mrb[12].mxu0  ;;  %v1359_v10 = vpop.f32.mrb[13].mxu1 }
 0x18d   : > { %v3254_v11 = vadd.f32 %v3236_v9, %v3132_v5  ;;  %v2280_v12 = vpop.f32.mrb[13].mxu0 }
 0x18e   : > { %v2365_v14 = vadd.f32 %v2364_v8, %v2350_v7  ;;  %v3255_v15 = vadd.f32 %v2280_v12, %v1359_v10  ;;  %v2326_v16 = vadd.f32 %v3252_v63, %v2325_v6 }
 0x18f   : > { %2392 = vst [vmem:[%s3828_s30 + $0x68] sm:$0xff] %v3254_v11  ;;  %v3135_v17 = vpop.f32.mrb[14].mxu1  ;;  %v2353_v25 = vmul.f32 %v3254_v11, %v3254_v11 }
 0x190   : > { %v2327_v18 = vadd.f32 %v3255_v15, %v2326_v16  ;;  %v2352_v19 = vmul.f32 %v3255_v15, %v3255_v15  ;;  %v2366_v20 = vadd.f32 %v2365_v14, %v2351_v13  ;;  %2391 = vst [vmem:[%s3828_s30 + $0x60] sm:$0xff] %v3255_v15  ;;  %v3239_v21 = vpop.f32.mrb[14].mxu0  ;;  %v1369_v22 = vpop.f32.mrb[15].mxu1 }
 0x191   : > { %v3256_v23 = vadd.f32 %v3239_v21, %v3135_v17  ;;  %v2290_v24 = vpop.f32.mrb[15].mxu0 }
 0x192   : > { %v2367_v26 = vadd.f32 %v2366_v20, %v2352_v19  ;;  %v3257_v27 = vadd.f32 %v2290_v24, %v1369_v22  ;;  %v2328_v28 = vadd.f32 %v3254_v11, %v2327_v18 }
 0x193   : > { %2394 = vst [vmem:[%s3828_s30 + $0x78] sm:$0xff] %v3256_v23 }
 0x194   : > { %v2329_v29 = vadd.f32 %v3257_v27, %v2328_v28  ;;  %v2354_v30 = vmul.f32 %v3257_v27, %v3257_v27  ;;  %v2368_v31 = vadd.f32 %v2367_v26, %v2353_v25  ;;  %2393 = vst [vmem:[%s3828_s30 + $0x70] sm:$0xff] %v3257_v27 }
 0x195   : > { %3492 = shalt.err (!%p3489_p1)
}
 0x196   : > { %s3493_s30 = scalar_lea.hbm %s4326_s8, 2048  ;;  %s3497_s12 = scalar_lea.hbm %s4474_s3, 8192 }
 0x197   : > { %p3494_p4 = scmp.ne.s32.totalorder %s4326_s8, %s3493_s30  ;;  %p3498_p6 = scmp.lt.u32.totalorder %s4326_s8, %s4474_s3 }
 0x198   : > { %p3499_p8 = scmp.lt.u32.totalorder %s3497_s12, %s3493_s30  ;;  %p3501_p10 = scmp.lt.u32.totalorder %s3493_s30, %s4326_s8 }
 0x199   : > { %p3495_p2 = pnand %p3494_p4, %p3770_p3 }
 0x19a   : > { %p3500_p9 = por %p3499_p8, %p3498_p6 }
 0x19b   : > { %p3496_p5 = pneg %p3495_p2 }
 0x19c   : > { %p3502_p11 = por %p3501_p10, %p3500_p9 }
 0x19e   : > { %p3503_p0 = pnand %p3502_p11, %p3496_p5 }
 0x1a0   : > { %3506 = shalt.err (!%p3503_p0)
}
 0x1a1   : > { %s3661_s6 = smov 128   ;;  %s3662_s23 = smov 8   ;;  %v2355_v32 = vmul.f32 %v3256_v23, %v3256_v23  ;;  %v2330_v33 = vadd.f32 %v3256_v23, %v2329_v29  ;;  %v2369_v34 = vadd.f32 %v2368_v31, %v2354_v30  ;;  %v2315_v45 = vld [vmem:[%s3830_s26] sm:$0x1] }
 0x1a2   : > { %3371 = dma.vmem_to_hbm [thread:$0]  (%p3770_p3), %s4328_s15, 2048, %s4326_s8, %s4334_s9, %s3661_s6, %s3661_s6, %s3662_s23  }
 0x1a3   : > { %v2331_v35 = vrot.slane %v2330_v33, 4  ;;  %v2370_v36 = vadd.f32 %v2369_v34, %v2355_v32  ;;  %s4493_s10 = sadd.s32 4294967295, %s3657_s27   ;;  %s2848_s15 = sshll.u32 %s3645_s24, 4  ;;  %v2339_v48 = vld [vmem:[%s3832_s25] sm:$0x1] }
 0x1a4   : > { %s4360_s30 = sand.u32 1, %s4493_s10   ;;  %s2436_s8 = sshll.u32 %s3830_s26, 4  ;;  %s4372_s8 = int_to_ptr.vmem [resolvable:$true] %s2436_s8 }
 0x1a5   : > { %v2332_v37 = vadd.f32 %v2331_v35, %v2330_v33  ;;  %v2371_v38 = vrot.slane %v2370_v36, 4  ;;  %s2449_s9 = sshll.u32 %s3832_s25, 4  ;;  %s4370_s12 = scalar_lea.hbm %s4475_s4, %s2848_s15  ;;  %s4380_s9 = int_to_ptr.vmem [resolvable:$true] %s2449_s9 }
 0x1a6   : > { %s4378_s14 = scalar_lea.hbm %s4476_s5, %s2848_s15  ;;  %s2401_s6 = scalar_lea.sflag [#allocation5], %s4360_s30 }
 0x1a7   : > { %v2333_v39 = vrot.slane %v2332_v37, 2  ;;  %v2372_v40 = vadd.f32 %v2371_v38, %v2370_v36  ;;  %s3507_s23 = scalar_lea.vmem %s4372_s8, 16  ;;  %s3663_s10 = smov [#allocation4]  }
 0x1a8   : > { %p3508_p3 = scmp.ne.s32.totalorder %s4372_s8, %s3507_s23  ;;  %s3511_s18 = sshll.u32 %s3663_s10, 4  ;;  %s3512_s18 = int_to_ptr.vmem [resolvable:$false] %s3511_s18 }
 0x1a9   : > { %v2373_v41 = vrot.slane %v2372_v40, 2  ;;  %v2334_v42 = vadd.f32 %v2333_v39, %v2332_v37  ;;  %s3513_s7 = scalar_lea.vmem %s3512_s18, 32  ;;  %p3514_p2 = scmp.lt.s32.totalorder %s4372_s8, %s3512_s18 }
 0x1aa   : > { %p3509_p1 = pnand %p3508_p3, %p3799_p12  ;;  %p3515_p5 = scmp.lt.s32.totalorder %s3513_s7, %s3507_s23 }
 0x1ab   : > { %v2335_v43 = vrot.slane %v2334_v42, 1  ;;  %v2374_v44 = vadd.f32 %v2373_v41, %v2372_v40 }
 0x1ac   : > { %p3510_p4 = pneg %p3509_p1  ;;  %p3516_p6 = por %p3515_p5, %p3514_p2 }
 0x1ad   : > { %v2336_v46 = vadd.f32 %v2335_v43, %v2334_v42  ;;  %v2375_v47 = vrot.slane %v2374_v44, 1 }
 0x1ae   : > { %p3517_p8 = pnand %p3516_p6, %p3510_p4 }
 0x1af   : > { %v2337_v49 = vadd.f32 %v2336_v46, %v2315_v45  ;;  %v2376_v50 = vadd.f32 %v2375_v47, %v2374_v44 }
 0x1b1   : > { %2338 = vst [vmem:[%s3830_s26] sm:$0x1] %v2337_v49  ;;  %v2377_v51 = vadd.f32 %v2376_v50, %v2339_v48 }
 0x1b2   : > { %3520 = shalt.err (!%p3517_p8)
}
 0x1b3   : > { %s3521_s26 = scalar_lea.hbm %s4370_s12, 16  ;;  %s3525_s11 = scalar_lea.hbm %s4475_s4, 32 }
 0x1b4   : > { %p3522_p9 = scmp.ne.s32.totalorder %s4370_s12, %s3521_s26  ;;  %p3526_p0 = scmp.lt.u32.totalorder %s4370_s12, %s4475_s4 }
 0x1b5   : > { %p3527_p3 = scmp.lt.u32.totalorder %s3525_s11, %s3521_s26  ;;  %p3529_p4 = scmp.lt.u32.totalorder %s3521_s26, %s4370_s12 }
 0x1b6   : > { %p3523_p10 = pnand %p3522_p9, %p3799_p12 }
 0x1b7   : > { %p3528_p1 = por %p3527_p3, %p3526_p0 }
 0x1b8   : > { %p3524_p11 = pneg %p3523_p10 }
 0x1b9   : > { %p3530_p2 = por %p3529_p4, %p3528_p1 }
 0x1bb   : > { %p3531_p5 = pnand %p3530_p2, %p3524_p11 }
 0x1bd   : > { %3534 = shalt.err (!%p3531_p5)
}
 0x1be   : > { %3372 = dma.vmem_to_hbm [thread:$0]  (%p3799_p12), %s4372_s8, 16, %s4370_s12, %s2401_s6   ;;  %2378 = vst [vmem:[%s3832_s25] sm:$0x1] %v2377_v51 }
 0x1bf   : > { %s3535_s23 = scalar_lea.vmem %s4380_s9, 16  ;;  %s3664_s7 = smov [#allocation6]  }
 0x1c0   : > { %p3536_p6 = scmp.ne.s32.totalorder %s4380_s9, %s3535_s23  ;;  %s3539_s26 = sshll.u32 %s3664_s7, 4  ;;  %s3540_s26 = int_to_ptr.vmem [resolvable:$false] %s3539_s26 }
 0x1c1   : > { %s3541_s15 = scalar_lea.vmem %s3540_s26, 32  ;;  %p3542_p10 = scmp.lt.s32.totalorder %s4380_s9, %s3540_s26 }
 0x1c2   : > { %p3537_p8 = pnand %p3536_p6, %p3799_p12  ;;  %p3543_p11 = scmp.lt.s32.totalorder %s3541_s15, %s3535_s23 }
 0x1c4   : > { %p3538_p9 = pneg %p3537_p8  ;;  %p3544_p0 = por %p3543_p11, %p3542_p10 }
 0x1c6   : > { %p3545_p3 = pnand %p3544_p0, %p3538_p9 }
 0x1c8   : > { %3548 = shalt.err (!%p3545_p3)
}
 0x1c9   : > { %s3549_s25 = scalar_lea.hbm %s4378_s14, 16  ;;  %s3553_s24 = scalar_lea.hbm %s4476_s5, 32 }
 0x1ca   : > { %p3550_p1 = scmp.ne.s32.totalorder %s4378_s14, %s3549_s25  ;;  %p3554_p5 = scmp.lt.u32.totalorder %s4378_s14, %s4476_s5 }
 0x1cb   : > { %p3555_p6 = scmp.lt.u32.totalorder %s3553_s24, %s3549_s25  ;;  %p3557_p9 = scmp.lt.u32.totalorder %s3549_s25, %s4378_s14 }
 0x1cc   : > { %p3551_p4 = pnand %p3550_p1, %p3799_p12 }
 0x1cd   : > { %p3556_p8 = por %p3555_p6, %p3554_p5 }
 0x1ce   : > { %p3552_p2 = pneg %p3551_p4 }
 0x1cf   : > { %p3558_p10 = por %p3557_p9, %p3556_p8 }
 0x1d1   : > { %p3559_p11 = pnand %p3558_p10, %p3552_p2 }
 0x1d3   : > { %3562 = shalt.err (!%p3559_p11)
}
 0x1d4   : > { %3373 = dma.vmem_to_hbm [thread:$0]  (%p3799_p12), %s4380_s9, 16, %s4378_s14, %s2401_s6  }
 0x1d5 PF: > { %p3387_p0 = scmp.ge.s32.totalorder %s3657_s27, 2  ;;  %s2461_s18 = sand.u32 1, %s3629_s2  }
 0x1d6   : > { %s2462_s23 = scalar_lea.sflag [#allocation3], %s2461_s18 }
 0x1d7   : > { %p3378_p3 = pnand %p3387_p0, %p3787_p7 }
 0x1d9   : > { %3608 = dma.done.wait (!%p3378_p3), %s2462_s23, 2048  }
 0x1da   : > { %3610 = vsyncadd (!%p3378_p3), %s2462_s23, 4294965248  ;;  %s4494_s7 = sadd.s32 4294967294, %s3657_s27   ;;  %p3381_p1 = pnand %p3387_p0, %p3811_p13 }
 0x1db   : > { %s2470_s16 = sand.u32 1, %s4494_s7  }
 0x1dc   : > { %s2471_s30 = scalar_lea.sflag [#allocation5], %s2470_s16 }
 0x1dd   : > { %3612 = dma.done.wait (!%p3381_p1), %s2471_s30, 32  }
 0x1de   : > { %3614 = vsyncadd (!%p3381_p1), %s2471_s30, 4294967264  ;;  %s22_s27 = sadd.s32 1, %s3657_s27   ;;  %s4495_s23 = sld [smem:[#allocation9_spill]] }
 0x1df   : > { %p19_p12 = scmp.ge.s32.totalorder %s22_s27, 6   ;;  %s4496_s24 = sld [smem:[#allocation10_spill]] }
 0x1e0   : > { %s4497_s25 = sld [smem:[#allocation11_spill]]  ;;  %s4498_s26 = sld [smem:[#allocation12_spill]] }
 0x1e1   : > { %s4499_s18 = smov %s3621_s19  ;;  %s4500_s19 = smov %s3625_s20 }
 0x1e2   : > { %s4501_s20 = smov %s3804_s17  ;;  %s4502_s2 = smov %s3633_s21 }
 0x1e3   : > { %s4503_s21 = smov %s3637_s22  ;;  %s4504_s22 = smov %s3807_s29 }
 0x1e4   :  { %21 = sbr.rel (!%p19_p12) target bundleno = 9 (0x9), region = 113 }
 0x1eb   :  { %2483 = vsyncpa [#allocation3], 1 }
 0x1ec   :  { %2485 = vsyncpa [#allocation3 + $0x1], 1 }
 0x1ed   :  { %2486 = vsyncpa [#allocation5], 1 }
 0x1ee   :  { %2488 = vsyncpa [#allocation5 + $0x1], 1 }

</bundles_post_ra>
